<compile_context>
chip_gen: v5e
topology: v5e:2x2
jax: 0.10.0
libtpu: 0.0.40
codegen_flags: <defaults>
</compile_context>

<pallas_src>
import math

import jax
import jax.numpy as jnp
from jax.experimental import pallas as pl
from jax.experimental.pallas import tpu as pltpu


def _round_up(a: int, b: int) -> int:
    return (a + b - 1) // b * b


def _support_kernel(x_ref, w_ref, s_ref):
    # One row tile of x against the full weight matrix (resident in VMEM).
    s_ref[...] = jnp.dot(
        x_ref[...], w_ref[...], preferred_element_type=jnp.float32
    ).astype(s_ref.dtype)


def _aggregate_kernel(adj_ref, s_ref, b_ref, o_ref, acc_ref):
    # grid = (row tiles [parallel], K tiles over the node dim [arbitrary]).
    k = pl.program_id(1)

    @pl.when(k == 0)
    def _():
        acc_ref[...] = jnp.zeros_like(acc_ref)

    acc_ref[...] += jnp.dot(
        adj_ref[...], s_ref[...], preferred_element_type=jnp.float32
    )

    @pl.when(k == pl.num_programs(1) - 1)
    def _():
        # Bias is added exactly once, at finalize.
        o_ref[...] = (acc_ref[...] + b_ref[...].astype(jnp.float32)).astype(o_ref.dtype)


def graph_convolution(x, weight, adj, bias, *, compute_dtype=None):
    """x: (N, in_f), weight: (in_f, out_f), adj: (N, N), bias: (out_f,)."""
    n, in_f = x.shape
    out_f = weight.shape[1]
    out_dtype = x.dtype

    if compute_dtype is not None:
        # e.g. jnp.bfloat16 on v6e/v7x: halves adj HBM bytes, f32 accumulation kept.
        x = x.astype(compute_dtype)
        weight = weight.astype(compute_dtype)
        adj = adj.astype(compute_dtype)

    # ---- tile sizes (multiples of 8 sublanes / 128 lanes, VMEM-friendly) ----
    if n < 128:
        tm = tk = _round_up(n, 8)          # whole (padded) array in one tile
    elif n < 512:
        tm, tk = 128, 128
    else:
        tm, tk = 128, 512                  # tk multiple of tm by construction

    n_pad = _round_up(n, max(tm, tk))
    in_f_pad = _round_up(in_f, 8)
    out_f_pad = _round_up(out_f, 128)      # lane-dense output stores

    # ---- zero padding (exact semantics; padded region sliced off at end) ----
    x_p = jnp.pad(x, ((0, n_pad - n), (0, in_f_pad - in_f)))
    w_p = jnp.pad(weight, ((0, in_f_pad - in_f), (0, out_f_pad - out_f)))
    adj_p = jnp.pad(adj, ((0, n_pad - n), (0, n_pad - n)))
    b_p = jnp.pad(bias.reshape(1, out_f), ((0, 0), (0, out_f_pad - out_f)))

    # ---- stage 1: support = x @ weight (computed once, row-tiled) ----------
    support = pl.pallas_call(
        _support_kernel,
        out_shape=jax.ShapeDtypeStruct((n_pad, out_f_pad), x_p.dtype),
        grid_spec=pltpu.PrefetchScalarGridSpec(
            num_scalar_prefetch=0,
            grid=(n_pad // tm,),
            in_specs=[
                pl.BlockSpec((tm, in_f_pad), lambda i: (i, 0)),
                pl.BlockSpec((in_f_pad, out_f_pad), lambda i: (0, 0)),
            ],
            out_specs=pl.BlockSpec((tm, out_f_pad), lambda i: (i, 0)),
        ),
        compiler_params=pltpu.CompilerParams(
            dimension_semantics=("parallel",)
        ),
    )(x_p, w_p)

    # ---- stage 2: out = adj @ support + bias (row tiles x K tiles) ---------
    # TODO(synk): torch.sparse gather-based SpMM has no clean Pallas
    # equivalent; adjacency is handled as a dense MXU matmul.
    out_p = pl.pallas_call(
        _aggregate_kernel,
        out_shape=jax.ShapeDtypeStruct((n_pad, out_f_pad), out_dtype),
        grid_spec=pltpu.PrefetchScalarGridSpec(
            num_scalar_prefetch=0,
            grid=(n_pad // tm, n_pad // tk),
            in_specs=[
                pl.BlockSpec((tm, tk), lambda i, k: (i, k)),          # adj tile
                pl.BlockSpec((tk, out_f_pad), lambda i, k: (k, 0)),   # support tile
                pl.BlockSpec((1, out_f_pad), lambda i, k: (0, 0)),    # bias
            ],
            out_specs=pl.BlockSpec((tm, out_f_pad), lambda i, k: (i, 0)),
            scratch_shapes=[pltpu.VMEM((tm, out_f_pad), jnp.float32)],
        ),
        compiler_params=pltpu.CompilerParams(
            dimension_semantics=("parallel", "arbitrary")
        ),
    )(adj_p, support, b_p)

    return out_p[:n, :out_f]


if __name__ == "__main__":
    key = jax.random.PRNGKey(0)
    k_x, k_adj, k_w, k_b = jax.random.split(key, 4)

    num_nodes = 16
    in_features = 8
    out_features = 32

    # Deterministic parameter init mirroring reset_parameters():
    # uniform(-stdv, stdv) with stdv = 1 / sqrt(out_features).
    stdv = 1.0 / math.sqrt(out_features)
    weight = jax.random.uniform(
        k_w, (in_features, out_features), jnp.float32, minval=-stdv, maxval=stdv
    )
    bias = jax.random.uniform(
        k_b, (out_features,), jnp.float32, minval=-stdv, maxval=stdv
    )

    x = jax.random.normal(k_x, (num_nodes, in_features), jnp.float32)
    adj = jax.random.uniform(k_adj, (num_nodes, num_nodes), jnp.float32)

    out = graph_convolution(x, weight, adj, bias)
    jax.block_until_ready(out)

    # Correctness check against a plain-JAX reference of the same math.
    ref = adj @ (x @ weight) + bias[None, :]
    assert out.shape == (num_nodes, out_features)
    assert jnp.allclose(out, ref, atol=1e-4, rtol=1e-4)

    print("KERNEL_OK")
</pallas_src>

<mosaic_0001>
module attributes {stable_mosaic.version = 11 : i64} {
  func.func @_support_kernel(%arg0: i32, %arg1: memref<16x8xf32, #tpu.memory_space<vmem>>, %arg2: memref<8x128xf32, #tpu.memory_space<vmem>>, %arg3: memref<16x128xf32, #tpu.memory_space<vmem>>) attributes {dimension_semantics = [#tpu.dimension_semantics<parallel>], iteration_bounds = array<i64: 1>, scalar_prefetch = 0 : i64, scratch_operands = 0 : i64, tpu.core_type = #tpu.core_type<tc>, window_params = [{transform_indices = @transform_0, window_bounds = array<i64: 16, 8>}, {pipeline_mode = #tpu.pipeline_mode<synchronous>, transform_indices = @transform_1, window_bounds = array<i64: 8, 128>}, {transform_indices = @transform_2, window_bounds = array<i64: 16, 128>}]} {
    %c0 = arith.constant 0 : index
    %c0_0 = arith.constant 0 : index
    %0 = vector.load %arg1[%c0, %c0_0] : memref<16x8xf32, #tpu.memory_space<vmem>>, vector<16x8xf32>
    %c0_1 = arith.constant 0 : index
    %c0_2 = arith.constant 0 : index
    %1 = vector.load %arg2[%c0_1, %c0_2] : memref<8x128xf32, #tpu.memory_space<vmem>>, vector<8x128xf32>
    %cst = arith.constant dense<0.000000e+00> : vector<16x128xf32>
    %2 = tpu.matmul %0, %1, %cst {dimension_numbers = #tpu.dot_dimension_numbers<[1], [0], [0], [1], [0, 0, 1, 1], [], []>} : vector<16x8xf32>, vector<8x128xf32>, vector<16x128xf32> -> vector<16x128xf32>
    %c0_3 = arith.constant 0 : index
    %c0_4 = arith.constant 0 : index
    %3 = vector.load %arg3[%c0_3, %c0_4] : memref<16x128xf32, #tpu.memory_space<vmem>>, vector<16x128xf32>
    tpu.vector_store %arg3[%c0_3, %c0_4], %2 {strides = array<i32>} : memref<16x128xf32, #tpu.memory_space<vmem>>, vector<16x128xf32>,
    return
  }
  func.func @transform_0(%arg0: i32) -> (i32, i32) {
    %c0_i32 = arith.constant 0 : i32
    %c0_i32_0 = arith.constant 0 : i32
    return %arg0, %c0_i32 : i32, i32
  }
  func.func @transform_1(%arg0: i32) -> (i32, i32) {
    %c0_i32 = arith.constant 0 : i32
    %c0_i32_0 = arith.constant 0 : i32
    %c0_i32_1 = arith.constant 0 : i32
    return %c0_i32, %c0_i32_0 : i32, i32
  }
  func.func @transform_2(%arg0: i32) -> (i32, i32) {
    %c0_i32 = arith.constant 0 : i32
    %c0_i32_0 = arith.constant 0 : i32
    return %arg0, %c0_i32 : i32, i32
  }
}

</mosaic_0001>

<bundles_post_ra>
// kernel: tpu_custom_call.1
= control target key start
LH: loop header
LB: loop body
LE: loop exit
PB: predicated region body
PF: predicated region fallthrough
CT: control target
= control target key end

     0   :  { %vm15_vm0 = vcmask 64512   ;;  %s127_s0 = inlined_call_operand.vmem [shape: f32[16,8], index: 0, kind: input, shape index: {}]   ;;  %s128_s1 = inlined_call_operand.vmem [shape: f32[8,128], index: 1, kind: input, shape index: {}]   ;;  %s129_s2 = inlined_call_operand.hbm [shape: f32[16,128], index: 2, kind: output, shape index: {}]  }
   0x1   :  { %v14_v0 = vld [vmem:[%s128_s1] sm:$0xff]  ;;  %v13_v2 = vld [vmem:[%s127_s0 + $0x8] sm:$0xff] }
   0x2   :  { %v12_v1 = vld [vmem:[%s127_s0] sm:$0xff]  ;;  %37 = vmatpush.msra.mxu0 %v14_v0  ;;  %67 = vmatpush.msra.mxu1 %v14_v0 }
   0x3   :  { %7 = vsyncpa [#allocation3], 0  ;;  %65 = vmatmul.msk.f32.vlgmr.msra.gmra.mxu0 %vm15_vm0, %v12_v1  ;;  %66 = vmatmul.msk.f32.vlgmr.msra.gmra.mxu1 %vm15_vm0, %v13_v2  ;;  %s97_s15 = smov [#allocation2]   ;;  %s53_s1 = sshll.u32 %s129_s2, 4  ;;  %s54_s1 = int_to_ptr.hbm [resolvable:$true] %s53_s1 }
   0x4   :  { %s51_s16 = sshll.u32 %s97_s15, 4  ;;  %s98_s19 = smov 128   ;;  %s52_s16 = int_to_ptr.vmem [resolvable:$true] %s51_s16 }
   0x5   :  { %s99_s20 = smov 8  }
  0x80   :  { %v39_v3 = vpop.f32.mrf.mxu0  ;;  %v42_v4 = vpop.f32.mrf.mxu1 }
  0x81   :  { %45 = vst [vmem:[#allocation2] sm:$0xff] %v39_v3 }
  0x82   :  { %46 = vst [vmem:[#allocation2 + $0x8] sm:$0xff] %v42_v4 }
  0x83   :  { %59 = dma.vmem_to_hbm [thread:$0]  %s52_s16, 256, %s54_s1, [#allocation3], %s98_s19, %s98_s19, %s99_s20  }
  0x84   :  { %95 = dma.done.wait [#allocation3], 256  }
  0x85   :  { %96 = vsyncadd [#allocation3], 4294967040 }
  0x86   :  { %64 = vsyncpa [#allocation3], 1 }

</bundles_post_ra>
